<compile_context>
chip_gen: v5e
topology: v5e:2x2
jax: 0.10.0
libtpu: 0.0.40
codegen_flags: <defaults>
</compile_context>

<pallas_src>
import functools

import jax
import jax.numpy as jnp
from jax.experimental import pallas as pl
from jax.experimental.pallas import tpu as pltpu

LANE = 128
SUBLANE = 8


def _round_up(x, m):
    return ((x + m - 1) // m) * m


def _cdiv(a, b):
    return (a + b - 1) // b


# --------------------------------------------------------------------------
# Kernel
# --------------------------------------------------------------------------
def actor_kernel(s_ref, w1_ref, b1_ref, w2_ref, b2_ref, w3_ref, b3_ref,
                 out_ref, *, action_dim):
    # Layer 1: bf16 MXU matmul, f32 accumulate; bias + ReLU in f32 (VPU).
    s_bf = s_ref[...].astype(jnp.bfloat16)
    h1 = jnp.dot(s_bf, w1_ref[...], preferred_element_type=jnp.float32)
    h1 = jnp.maximum(h1 + b1_ref[...], 0.0)

    # Layer 2: Linear + ReLU.
    h2 = jnp.dot(h1.astype(jnp.bfloat16), w2_ref[...],
                 preferred_element_type=jnp.float32)
    h2 = jnp.maximum(h2 + b2_ref[...], 0.0)

    # Layer 3: Linear -> logits.  Padded lanes carry a -1e9 bias (baked into
    # b3 at param-prep time) so they contribute exactly zero probability.
    logits = jnp.dot(h2.astype(jnp.bfloat16), w3_ref[...],
                     preferred_element_type=jnp.float32)
    logits = logits + b3_ref[...]

    # Numerically-stable softmax with an exact divide (rows sum to 1).
    m = jnp.max(logits, axis=-1, keepdims=True)
    e = jnp.exp(logits - m)
    denom = jnp.sum(e, axis=-1, keepdims=True)
    probs = e / denom

    # Store only the real action lanes; output array is (b_pad, action_dim).
    out_ref[...] = probs[:, :action_dim].astype(out_ref.dtype)


# --------------------------------------------------------------------------
# Wrapper
# --------------------------------------------------------------------------
def actor_forward(s, padded_params, action_dim, *,
                  tile_b_max=4096, min_rows_for_split=1024):
    """s: (B, state_dim) f32.  padded_params: lane-padded bf16/f32 params."""
    w1, b1, w2, b2, w3, b3 = (
        padded_params["w1"], padded_params["b1"], padded_params["w2"],
        padded_params["b2"], padded_params["w3"], padded_params["b3"],
    )
    B, state_dim = s.shape
    h0p = w1.shape[1]
    h1p = w2.shape[1]
    ap = w3.shape[1]  # lane-padded action dim

    # Balanced batch tiling: pick the number of tiles first so the last tile
    # isn't mostly padding, then round the tile to the sublane multiple.
    n_tiles = _cdiv(max(B, 1), tile_b_max)
    if n_tiles == 1 and B >= min_rows_for_split:
        n_tiles = 2  # give megacore (v7x) at least 2 grid steps to shard
    tile_b = _round_up(_cdiv(max(B, 1), n_tiles), SUBLANE)
    b_pad = n_tiles * tile_b
    if b_pad != B:
        s = jnp.pad(s, ((0, b_pad - B), (0, 0)))

    grid = (n_tiles,)

    flops = 2 * b_pad * (state_dim * h0p + h0p * h1p + h1p * ap)
    bytes_accessed = (
        s.size * s.dtype.itemsize
        + sum(int(p.size) * p.dtype.itemsize for p in (w1, b1, w2, b2, w3, b3))
        + b_pad * action_dim * 4
    )
    cost = pl.CostEstimate(
        flops=flops,
        transcendentals=b_pad * ap,  # exp per logit lane
        bytes_accessed=bytes_accessed,
    )

    def resident(shape):
        # Full-array block with constant index_map -> stays in VMEM across grid.
        return pl.BlockSpec(shape, lambda i: (0, 0))

    out = pl.pallas_call(
        functools.partial(actor_kernel, action_dim=action_dim),
        out_shape=jax.ShapeDtypeStruct((b_pad, action_dim), jnp.float32),
        grid=grid,
        in_specs=[
            pl.BlockSpec((tile_b, state_dim), lambda i: (i, 0)),  # batch-tiled
            resident(w1.shape), resident(b1.shape),
            resident(w2.shape), resident(b2.shape),
            resident(w3.shape), resident(b3.shape),
        ],
        out_specs=pl.BlockSpec((tile_b, action_dim), lambda i: (i, 0)),
        compiler_params=pltpu.CompilerParams(
            dimension_semantics=("parallel",),     # megacore split on v7x
            vmem_limit_bytes=40 * 1024 * 1024,     # safe on v7x (64 MiB VMEM)
        ),
        cost_estimate=cost,
    )(s, w1, b1, w2, b2, w3, b3)

    if b_pad != B:
        out = out[:B]
    return out


# --------------------------------------------------------------------------
# Parameter init (matches torch xavier_uniform_ + bias.fill_(0.01)) + padding
# --------------------------------------------------------------------------
def xavier_uniform(key, fan_in, fan_out, dtype=jnp.float32):
    bound = (6.0 / (fan_in + fan_out)) ** 0.5
    return jax.random.uniform(
        key, (fan_in, fan_out), dtype=dtype, minval=-bound, maxval=bound)


def init_actor_params(key, state_dim, action_dim, n_hidden_units):
    h0, h1 = n_hidden_units
    k1, k2, k3 = jax.random.split(key, 3)
    return {
        "w1": xavier_uniform(k1, state_dim, h0),
        "b1": jnp.full((1, h0), 0.01, dtype=jnp.float32),
        "w2": xavier_uniform(k2, h0, h1),
        "b2": jnp.full((1, h1), 0.01, dtype=jnp.float32),
        "w3": xavier_uniform(k3, h1, action_dim),
        "b3": jnp.full((1, action_dim), 0.01, dtype=jnp.float32),
    }


def pad_params_for_tpu(params, lane=LANE):
    """Zero-pad feature dims to lane width.  Weights -> bf16 (MXU path),
    biases stay f32.  Padded lanes of b3 are set to -1e9 so the softmax gives
    them exactly zero probability (no in-kernel mask needed)."""
    def pad_w(x, rows, cols):
        out = jnp.zeros((rows, cols), jnp.bfloat16)
        return out.at[: x.shape[0], : x.shape[1]].set(x.astype(jnp.bfloat16))

    def pad_b(x, cols, pad_value=0.0):
        out = jnp.full((1, cols), pad_value, dtype=jnp.float32)
        return out.at[:, : x.shape[1]].set(x.astype(jnp.float32))

    state_dim, h0 = params["w1"].shape
    h1 = params["w2"].shape[1]
    a = params["w3"].shape[1]
    h0p, h1p, ap = (_round_up(d, lane) for d in (h0, h1, a))
    return {
        "w1": pad_w(params["w1"], state_dim, h0p),
        "b1": pad_b(params["b1"], h0p),
        "w2": pad_w(params["w2"], h0p, h1p),
        "b2": pad_b(params["b2"], h1p),
        "w3": pad_w(params["w3"], h1p, ap),
        "b3": pad_b(params["b3"], ap, pad_value=-1e9),
    }


# --------------------------------------------------------------------------
# Pure-JAX reference (same bf16-dot / f32-accumulate arithmetic as the kernel)
# --------------------------------------------------------------------------
def actor_forward_ref(s, p):
    def mm(x, w):
        return jnp.dot(x.astype(jnp.bfloat16), w.astype(jnp.bfloat16),
                       preferred_element_type=jnp.float32)
    h1 = jnp.maximum(mm(s, p["w1"]) + p["b1"], 0.0)
    h2 = jnp.maximum(mm(h1, p["w2"]) + p["b2"], 0.0)
    logits = mm(h2, p["w3"]) + p["b3"]
    return jax.nn.softmax(logits, axis=-1)


if __name__ == "__main__":
    # Small shapes consistent with the module: state_dim=16, hidden=(32, 32),
    # action_dim=8, batch=2.
    state_dim, action_dim = 16, 8
    n_hidden_units = (32, 32)
    batch = 2

    key = jax.random.PRNGKey(0)
    k_params, k_state = jax.random.split(key)
    params = init_actor_params(k_params, state_dim, action_dim, n_hidden_units)
    padded_params = pad_params_for_tpu(params)
    s = jax.random.normal(k_state, (batch, state_dim), dtype=jnp.float32)

    probs = actor_forward(s, padded_params, action_dim)
    probs = jax.block_until_ready(probs)

    # Sanity check against a pure-JAX reference.
    ref = actor_forward_ref(s, params)
    assert probs.shape == (batch, action_dim)
    assert jnp.allclose(probs, ref, atol=2e-3, rtol=2e-3)
    assert jnp.allclose(jnp.sum(probs, axis=-1), 1.0, atol=1e-3)

    print("KERNEL_OK")
</pallas_src>

<mosaic_0001>
module attributes {stable_mosaic.version = 11 : i64} {
  func.func @actor_kernel(%arg0: i32, %arg1: memref<8x16xf32, #tpu.memory_space<vmem>>, %arg2: memref<16x128xbf16, #tpu.memory_space<vmem>>, %arg3: memref<1x128xf32, #tpu.memory_space<vmem>>, %arg4: memref<128x128xbf16, #tpu.memory_space<vmem>>, %arg5: memref<1x128xf32, #tpu.memory_space<vmem>>, %arg6: memref<128x128xbf16, #tpu.memory_space<vmem>>, %arg7: memref<1x128xf32, #tpu.memory_space<vmem>>, %arg8: memref<8x8xf32, #tpu.memory_space<vmem>>) attributes {dimension_semantics = [#tpu.dimension_semantics<parallel>], iteration_bounds = array<i64: 1>, scalar_prefetch = 0 : i64, scratch_operands = 0 : i64, tpu.core_type = #tpu.core_type<tc>, window_params = [{transform_indices = @transform_0, window_bounds = array<i64: 8, 16>}, {pipeline_mode = #tpu.pipeline_mode<synchronous>, transform_indices = @transform_1, window_bounds = array<i64: 16, 128>}, {pipeline_mode = #tpu.pipeline_mode<synchronous>, transform_indices = @transform_2, window_bounds = array<i64: 1, 128>}, {pipeline_mode = #tpu.pipeline_mode<synchronous>, transform_indices = @transform_3, window_bounds = array<i64: 128, 128>}, {pipeline_mode = #tpu.pipeline_mode<synchronous>, transform_indices = @transform_4, window_bounds = array<i64: 1, 128>}, {pipeline_mode = #tpu.pipeline_mode<synchronous>, transform_indices = @transform_5, window_bounds = array<i64: 128, 128>}, {pipeline_mode = #tpu.pipeline_mode<synchronous>, transform_indices = @transform_6, window_bounds = array<i64: 1, 128>}, {transform_indices = @transform_7, window_bounds = array<i64: 8, 8>}]} {
    %c0 = arith.constant 0 : index
    %c0_0 = arith.constant 0 : index
    %0 = vector.load %arg1[%c0, %c0_0] : memref<8x16xf32, #tpu.memory_space<vmem>>, vector<8x16xf32>
    %1 = arith.truncf %0 : vector<8x16xf32> to vector<8x16xbf16>
    %c0_1 = arith.constant 0 : index
    %c0_2 = arith.constant 0 : index
    %2 = vector.load %arg2[%c0_1, %c0_2] : memref<16x128xbf16, #tpu.memory_space<vmem>>, vector<16x128xbf16>
    %cst = arith.constant dense<0.000000e+00> : vector<8x128xf32>
    %3 = tpu.matmul %1, %2, %cst {dimension_numbers = #tpu.dot_dimension_numbers<[1], [0], [0], [1], [0, 0, 1, 1], [], []>} : vector<8x16xbf16>, vector<16x128xbf16>, vector<8x128xf32> -> vector<8x128xf32>
    %c0_3 = arith.constant 0 : index
    %c0_4 = arith.constant 0 : index
    %4 = vector.load %arg3[%c0_3, %c0_4] : memref<1x128xf32, #tpu.memory_space<vmem>>, vector<1x128xf32>
    %5 = vector.broadcast %4 : vector<1x128xf32> to vector<8x128xf32>
    %6 = arith.addf %3, %5 : vector<8x128xf32>
    %cst_5 = arith.constant 0.000000e+00 : f32
    %7 = vector.broadcast %cst_5 : f32 to vector<8x128xf32>
    %8 = arith.maximumf %6, %7 : vector<8x128xf32>
    %9 = arith.truncf %8 : vector<8x128xf32> to vector<8x128xbf16>
    %c0_6 = arith.constant 0 : index
    %c0_7 = arith.constant 0 : index
    %10 = vector.load %arg4[%c0_6, %c0_7] : memref<128x128xbf16, #tpu.memory_space<vmem>>, vector<128x128xbf16>
    %cst_8 = arith.constant dense<0.000000e+00> : vector<8x128xf32>
    %11 = tpu.matmul %9, %10, %cst_8 {dimension_numbers = #tpu.dot_dimension_numbers<[1], [0], [0], [1], [0, 0, 1, 1], [], []>} : vector<8x128xbf16>, vector<128x128xbf16>, vector<8x128xf32> -> vector<8x128xf32>
    %c0_9 = arith.constant 0 : index
    %c0_10 = arith.constant 0 : index
    %12 = vector.load %arg5[%c0_9, %c0_10] : memref<1x128xf32, #tpu.memory_space<vmem>>, vector<1x128xf32>
    %13 = vector.broadcast %12 : vector<1x128xf32> to vector<8x128xf32>
    %14 = arith.addf %11, %13 : vector<8x128xf32>
    %cst_11 = arith.constant 0.000000e+00 : f32
    %15 = vector.broadcast %cst_11 : f32 to vector<8x128xf32>
    %16 = arith.maximumf %14, %15 : vector<8x128xf32>
    %17 = arith.truncf %16 : vector<8x128xf32> to vector<8x128xbf16>
    %c0_12 = arith.constant 0 : index
    %c0_13 = arith.constant 0 : index
    %18 = vector.load %arg6[%c0_12, %c0_13] : memref<128x128xbf16, #tpu.memory_space<vmem>>, vector<128x128xbf16>
    %cst_14 = arith.constant dense<0.000000e+00> : vector<8x128xf32>
    %19 = tpu.matmul %17, %18, %cst_14 {dimension_numbers = #tpu.dot_dimension_numbers<[1], [0], [0], [1], [0, 0, 1, 1], [], []>} : vector<8x128xbf16>, vector<128x128xbf16>, vector<8x128xf32> -> vector<8x128xf32>
    %c0_15 = arith.constant 0 : index
    %c0_16 = arith.constant 0 : index
    %20 = vector.load %arg7[%c0_15, %c0_16] : memref<1x128xf32, #tpu.memory_space<vmem>>, vector<1x128xf32>
    %21 = vector.broadcast %20 : vector<1x128xf32> to vector<8x128xf32>
    %22 = arith.addf %19, %21 : vector<8x128xf32>
    %cst_17 = arith.constant dense<0xFF800000> : vector<8xf32>
    %23 = vector.multi_reduction <maximumf>, %22, %cst_17 [1] : vector<8x128xf32> to vector<8xf32>
    %24 = vector.shape_cast %23 : vector<8xf32> to vector<8x1xf32>
    %25 = vector.broadcast %24 : vector<8x1xf32> to vector<8x128xf32>
    %26 = arith.subf %22, %25 : vector<8x128xf32>
    %27 = math.exp %26 : vector<8x128xf32>
    %cst_18 = arith.constant dense<0.000000e+00> : vector<8xf32>
    %28 = vector.multi_reduction <add>, %27, %cst_18 [1] : vector<8x128xf32> to vector<8xf32>
    %29 = vector.shape_cast %28 : vector<8xf32> to vector<8x1xf32>
    %30 = vector.broadcast %29 : vector<8x1xf32> to vector<8x128xf32>
    %31 = arith.divf %27, %30 : vector<8x128xf32>
    %32 = vector.extract_strided_slice %31 {offsets = [0, 0], sizes = [8, 8], strides = [1, 1]} : vector<8x128xf32> to vector<8x8xf32>
    %c0_19 = arith.constant 0 : index
    %c0_20 = arith.constant 0 : index
    %33 = vector.load %arg8[%c0_19, %c0_20] : memref<8x8xf32, #tpu.memory_space<vmem>>, vector<8x8xf32>
    tpu.vector_store %arg8[%c0_19, %c0_20], %32 {strides = array<i32>} : memref<8x8xf32, #tpu.memory_space<vmem>>, vector<8x8xf32>,
    return
  }
  func.func @transform_0(%arg0: i32) -> (i32, i32) {
    %c0_i32 = arith.constant 0 : i32
    %c0_i32_0 = arith.constant 0 : i32
    return %arg0, %c0_i32 : i32, i32
  }
  func.func @transform_1(%arg0: i32) -> (i32, i32) {
    %c0_i32 = arith.constant 0 : i32
    %c0_i32_0 = arith.constant 0 : i32
    %c0_i32_1 = arith.constant 0 : i32
    return %c0_i32, %c0_i32_0 : i32, i32
  }
  func.func @transform_2(%arg0: i32) -> (i32, i32) {
    %c0_i32 = arith.constant 0 : i32
    %c0_i32_0 = arith.constant 0 : i32
    %c0_i32_1 = arith.constant 0 : i32
    return %c0_i32, %c0_i32_0 : i32, i32
  }
  func.func @transform_3(%arg0: i32) -> (i32, i32) {
    %c0_i32 = arith.constant 0 : i32
    %c0_i32_0 = arith.constant 0 : i32
    %c0_i32_1 = arith.constant 0 : i32
    return %c0_i32, %c0_i32_0 : i32, i32
  }
  func.func @transform_4(%arg0: i32) -> (i32, i32) {
    %c0_i32 = arith.constant 0 : i32
    %c0_i32_0 = arith.constant 0 : i32
    %c0_i32_1 = arith.constant 0 : i32
    return %c0_i32, %c0_i32_0 : i32, i32
  }
  func.func @transform_5(%arg0: i32) -> (i32, i32) {
    %c0_i32 = arith.constant 0 : i32
    %c0_i32_0 = arith.constant 0 : i32
    %c0_i32_1 = arith.constant 0 : i32
    return %c0_i32, %c0_i32_0 : i32, i32
  }
  func.func @transform_6(%arg0: i32) -> (i32, i32) {
    %c0_i32 = arith.constant 0 : i32
    %c0_i32_0 = arith.constant 0 : i32
    %c0_i32_1 = arith.constant 0 : i32
    return %c0_i32, %c0_i32_0 : i32, i32
  }
  func.func @transform_7(%arg0: i32) -> (i32, i32) {
    %c0_i32 = arith.constant 0 : i32
    %c0_i32_0 = arith.constant 0 : i32
    return %arg0, %c0_i32 : i32, i32
  }
}

</mosaic_0001>

<bundles_post_ra>
// kernel: tpu_custom_call.1
= control target key start
LH: loop header
LB: loop body
LE: loop exit
PB: predicated region body
PF: predicated region fallthrough
CT: control target
= control target key end

     0   :  { %12 = vsyncpa [#allocation3], 0  ;;  %s628_s0 = inlined_call_operand.hbm [shape: f32[8,16], index: 0, kind: input, shape index: {}]   ;;  %s629_s1 = inlined_call_operand.hbm [shape: bf16[16,128], index: 1, kind: input, shape index: {}]   ;;  %s630_s2 = inlined_call_operand.vmem [shape: f32[1,128], index: 2, kind: input, shape index: {}]   ;;  %s631_s3 = inlined_call_operand.hbm [shape: bf16[128,128], index: 3, kind: input, shape index: {}]   ;;  %s632_s4 = inlined_call_operand.vmem [shape: f32[1,128], index: 4, kind: input, shape index: {}]   ;;  %s633_s5 = inlined_call_operand.hbm [shape: bf16[128,128], index: 5, kind: input, shape index: {}]   ;;  %s634_s6 = inlined_call_operand.vmem [shape: f32[1,128], index: 6, kind: input, shape index: {}]   ;;  %s635_s7 = inlined_call_operand.hbm [shape: f32[8,8], index: 7, kind: output, shape index: {}]  }
   0x1   :  { %13 = vsyncpa [#allocation6], 0 }
   0x2   :  { %14 = vsyncpa [#allocation9], 0  ;;  %s31_s26 = sshll.u32 %s629_s1, 4  ;;  %s32_s26 = int_to_ptr.hbm [resolvable:$true] %s31_s26 }
   0x3   :  { %15 = vsyncpa [#allocation4], 0  ;;  %s557_s27 = smov [#allocation5]   ;;  %s21_s8 = sshll.u32 %s628_s0, 4  ;;  %s22_s8 = int_to_ptr.hbm [resolvable:$true] %s21_s8 }
   0x4   :  { %s33_s28 = sshll.u32 %s557_s27, 4  ;;  %s558_s9 = smov 64   ;;  %s34_s28 = int_to_ptr.vmem [resolvable:$true] %s33_s28 }
   0x5   :  { %s559_s10 = smov 4   ;;  %s560_s11 = smov [#allocation2]  }
   0x6   :  { %39 = dma.hbm_to_vmem [thread:$0]  %s32_s26, 128, %s34_s28, [#allocation6], %s558_s9, %s558_s9, %s559_s10  }
   0x7   :  { %s23_s12 = sshll.u32 %s560_s11, 4  ;;  %s46_s15 = sshll.u32 %s631_s3, 4  ;;  %s24_s12 = int_to_ptr.vmem [resolvable:$true] %s23_s12  ;;  %s47_s15 = int_to_ptr.hbm [resolvable:$true] %s46_s15 }
   0x8   :  { %26 = dma.hbm_to_vmem [thread:$0]  %s22_s8, 128, %s24_s12, [#allocation3]  }
   0x9   :  { %s61_s17 = sshll.u32 %s633_s5, 4  ;;  %s561_s18 = smov [#allocation7]   ;;  %s62_s17 = int_to_ptr.hbm [resolvable:$true] %s61_s17 }
   0xa   :  { %s48_s19 = sshll.u32 %s561_s18, 4  ;;  %s562_s0 = smov [#allocation8]   ;;  %s49_s19 = int_to_ptr.vmem [resolvable:$true] %s48_s19 }
   0xb   :  { %54 = dma.hbm_to_vmem [thread:$0]  %s47_s15, 1024, %s49_s19, [#allocation6], %s558_s9, %s558_s9, %s559_s10  }
   0xc   :  { %s63_s20 = sshll.u32 %s562_s0, 4  ;;  %s64_s20 = int_to_ptr.vmem [resolvable:$true] %s63_s20 }
   0xd   :  { %69 = dma.hbm_to_vmem [thread:$0]  %s62_s17, 1024, %s64_s20, [#allocation9], %s558_s9, %s558_s9, %s559_s10  }
   0xe   :  { %549 = dma.done.wait [#allocation3], 128  }
   0xf   :  { %550 = vsyncadd [#allocation3], 4294967168 }
  0x10   :  { %551 = dma.done.wait [#allocation6], 1152  }
  0x11   :  { %552 = vsyncadd [#allocation6], 4294966144 }
  0x12   :  { %553 = dma.done.wait [#allocation9], 1024  }
  0x13   :  { %554 = vsyncadd [#allocation9], 4294966272  ;;  %v398_v0 = vld [vmem:[#allocation5] sm:$0xff]  ;;  %v89_v1 = vld [vmem:[#allocation2] sm:$0xff]  ;;  %vm103_vm0 = vcmask 130048   ;;  %s317_s26 = sshll.u32 %s635_s7, 4  ;;  %s318_s26 = int_to_ptr.hbm [resolvable:$true] %s317_s26 }
  0x14   :  { %v406_v2 = vld [vmem:[#allocation7 + $0x38] sm:$0xff]  ;;  %v90_v3 = vpack.c.bf16 %v89_v1, %v89_v1  ;;  %114 = vmatpush.bf16.msra.mxu0 %v398_v0  ;;  %v405_v4 = vld [vmem:[#allocation7 + $0x30] sm:$0xff]  ;;  %v404_v5 = vld [vmem:[#allocation7 + $0x28] sm:$0xff]  ;;  %vm308_vm5 = vcmask 64512  }
  0x15   :  { %190 = vmatpush.bf16.msra.mxu1 %v406_v2  ;;  %v403_v6 = vld [vmem:[#allocation7 + $0x20] sm:$0xff]  ;;  %v402_v7 = vld [vmem:[#allocation7 + $0x18] sm:$0xff]  ;;  %v401_v8 = vld [vmem:[#allocation7 + $0x10] sm:$0xff] }
  0x16   :  { %v400_v9 = vld [vmem:[#allocation7 + $0x8] sm:$0xff]  ;;  %v399_v10 = vld [vmem:[#allocation7] sm:$0xff]  ;;  %v414_v11 = vld [vmem:[#allocation8 + $0x38] sm:$0xff] }
  0x17   :  { %333 = vmatmul.msk.bf16.vlgmr.msra.gmra.mxu0 %vm103_vm0, %v90_v3  ;;  %273 = vmatpush.bf16.msra.mxu2 %v414_v11  ;;  %v413_v12 = vld [vmem:[#allocation8 + $0x30] sm:$0xff]  ;;  %v412_v13 = vld [vmem:[#allocation8 + $0x28] sm:$0xff]  ;;  %v411_v14 = vld [vmem:[#allocation8 + $0x20] sm:$0xff] }
  0x18   :  { %v410_v15 = vld [vmem:[#allocation8 + $0x18] sm:$0xff]  ;;  %v409_v16 = vld [vmem:[#allocation8 + $0x10] sm:$0xff]  ;;  %v408_v23 = vld [vmem:[#allocation8 + $0x8] sm:$0xff] }
  0x19   :  { %191 = vmatpush.bf16.msra.mxu1 %v405_v4  ;;  %v422_v17 = vld [vmem:[%s630_s2] ss:$0 sm:$0xff]  ;;  %v407_v24 = vld [vmem:[#allocation8] sm:$0xff] }
  0x1a   :  { %v423_v25 = vld [vmem:[%s632_s4] ss:$0 sm:$0xff]  ;;  %s563_s4 = smov [#allocation10]  }
  0x1b   :  { %274 = vmatpush.bf16.msra.mxu2 %v413_v12  ;;  %v424_v31 = vld [vmem:[%s634_s6] ss:$0 sm:$0xff]  ;;  %s315_s6 = sshll.u32 %s563_s4, 4  ;;  %s316_s6 = int_to_ptr.vmem [resolvable:$true] %s315_s6 }
  0x1d   :  { %192 = vmatpush.bf16.msra.mxu1 %v404_v5 }
  0x1f   :  { %275 = vmatpush.bf16.msra.mxu2 %v412_v13 }
  0x21   :  { %193 = vmatpush.bf16.msra.mxu1 %v403_v6 }
  0x23   :  { %276 = vmatpush.bf16.msra.mxu2 %v411_v14 }
  0x25   :  { %194 = vmatpush.bf16.msra.mxu1 %v402_v7 }
  0x27   :  { %277 = vmatpush.bf16.msra.mxu2 %v410_v15 }
  0x29   :  { %195 = vmatpush.bf16.msra.mxu1 %v401_v8 }
  0x2b   :  { %278 = vmatpush.bf16.msra.mxu2 %v409_v16 }
  0x2d   :  { %196 = vmatpush.bf16.msra.mxu1 %v400_v9 }
  0x2f   :  { %279 = vmatpush.bf16.msra.mxu2 %v408_v23 }
  0x31   :  { %197 = vmatpush.bf16.msra.mxu1 %v399_v10 }
  0x33   :  { %280 = vmatpush.bf16.msra.mxu2 %v407_v24 }
  0x94   :  { %v116_v18 = vpop.f32.mrf.mxu0 }
  0x95   :  { %v117_v19 = vadd.f32 %v422_v17, %v116_v18 }
  0x97   :  { %v120_v20 = vmax.f32 %v117_v19, 0.0 }
  0x99   :  { %v121_v21 = vpack.c.bf16 %v120_v20, %v120_v20 }
  0x9b   :  { %198 = vmatmul.bf16.vlgmr.msra.gmra.mxu1 %v121_v21 }
  0x9c   :  { %v118_v22 = vpop.f32.mrf.mxu0 }
 0x118   :  { %v199_v26 = vpop.f32.mrf.mxu1 }
 0x119   :  { %v200_v27 = vadd.f32 %v423_v25, %v199_v26 }
 0x11b   :  { %v203_v28 = vmax.f32 %v200_v27, 0.0 }
 0x11d   :  { %v204_v29 = vpack.c.bf16 %v203_v28, %v203_v28 }
 0x11f   :  { %281 = vmatmul.bf16.vlgmr.msra.gmra.mxu2 %v204_v29 }
 0x120   :  { %v201_v30 = vpop.f32.mrf.mxu1 }
 0x1a2   :  { %v282_v32 = vpop.f32.mrf.mxu2 }
 0x1a3   :  { %v283_v33 = vadd.f32 %v424_v31, %v282_v32 }
 0x1a5   :  { %286 = vmax.xlane.f32.xlu0 %v283_v33 }
 0x1aa   :  { %v284_v34 = vpop.f32.mrf.mxu2 }
 0x218   :  { %v287_v35 = vpop.xlane.xlu0 %286 }
 0x219   :  { %v288_v36 = vsub.f32 %v283_v33, %v287_v35 }
 0x21b   :  { %v289_v37 = vmul.f32 1.442695, %v288_v36 }
 0x21d   :  { %425 = vpow2.f32 %v289_v37 }
 0x223   :  { %v426_v38 = vpop.eup %425 }
 0x224   :  { %291 = vadd.xlane.f32.xlu0 %v426_v38 }
 0x297   :  { %v292_v39 = vpop.xlane.xlu0 %291 }
 0x298   :  { %427 = vrcp.f32 %v292_v39  ;;  %v304_v43 = vand.u32 2147483648, %v292_v39  ;;  %v302_v45 = vand.u32 2147483647, %v292_v39  ;;  %vm298_vm2 = vweird.f32 %v292_v39 }
 0x29a   :  { %v305_v47 = vor.u32 1.1754944e-38, %v304_v43  ;;  %vm303_vm4 = vcmp.eq.f32.partialorder %v302_v45, 8.507059e+37 }
 0x29e   :  { %v428_v40 = vpop.eup %427 }
 0x29f   :  { %v294_v41 = vmul.f32 %v428_v40, %v292_v39  ;;  %vm299_vm1 = vweird.f32 %v428_v40 }
 0x2a0   :  { %vm300_vm3 = vmor %vm298_vm2, %vm299_vm1 }
 0x2a1   :  { %v295_v42 = vsub.f32 1.0, %v294_v41 }
 0x2a3   :  { %v296_v44 = vmul.f32 %v428_v40, %v295_v42 }
 0x2a5   :  { %v297_v46 = vadd.f32 %v428_v40, %v296_v44 }
 0x2a7   :  { %v301_v48 = vsel %vm300_vm3, %v428_v40, %v297_v46 }
 0x2a8   :  { %v306_v49 = vsel %vm303_vm4, %v305_v47, %v301_v48 }
 0x2a9   :  { %v307_v50 = vmul.f32 %v426_v38, %v306_v49 }
 0x2ab   :  { %309 = vst.msk [vmem:[#allocation10] sm:$0xff] %vm308_vm5, %v307_v50 }
 0x2ac   :  { %320 = dma.vmem_to_hbm [thread:$0]  %s316_s6, 128, %s318_s26, [#allocation4]  }
 0x2ad   :  { %555 = dma.done.wait [#allocation4], 128  }
 0x2ae   :  { %556 = vsyncadd [#allocation4], 4294967168 }
 0x2af   :  { %325 = vsyncpa [#allocation3], 1 }
 0x2b0   :  { %326 = vsyncpa [#allocation6], 1 }
 0x2b1   :  { %327 = vsyncpa [#allocation9], 1 }
 0x2b2   :  { %328 = vsyncpa [#allocation4], 1 }

</bundles_post_ra>
